<compile_context>
chip_gen: v6e
topology: v6e:2x2x1
jax: 0.10.0
libtpu: 0.0.40
codegen_flags: <defaults>
</compile_context>

<pallas_src>
import jax
import jax.numpy as jnp
from jax import lax
from jax.experimental import pallas as pl
from jax.experimental.pallas import tpu as pltpu

EPS = 1e-05
LANE = 128
SUBLANE = 8
VMEM_BUDGET = 20 * 1024 * 1024  # headroom under the 32 MiB scoped limit


def graphnorm_kernel(seg_m_ref, seg_t_ref, x_ref, w_ref, b_ref, ms_ref, o_ref):
    """One D-tile of GraphNorm.

    seg_m_ref: [B, Np]  membership scaled by 1/node_count (segment-mean matrix)
    seg_t_ref: [Np, B]  0/1 membership, pre-transposed in the wrapper
    x_ref:     [Np, tD] feature tile
    w/b/ms:    [1, tD]  parameter tiles
    o_ref:     [Np, tD] output tile
    """
    seg_m = seg_m_ref[...]
    seg_t = seg_t_ref[...]
    x = x_ref[...]

    # per-graph mean: counts already folded into seg_m -> single MXU matmul
    mean_g = jnp.dot(seg_m, x, preferred_element_type=jnp.float32)            # [B, tD]
    # fold mean_scale at the [B, tD] level, then broadcast to nodes via matmul
    mean_n = jnp.dot(seg_t, mean_g * ms_ref[...],
                     preferred_element_type=jnp.float32)                      # [Np, tD]
    demean = x - mean_n                                                       # [Np, tD]

    # per-graph variance of demeaned feats; rsqrt on the small [B, tD] (EUP),
    # weight folded in before the broadcast -> hot Np x tD op is one vmul.
    var_g = jnp.dot(seg_m, demean * demean,
                    preferred_element_type=jnp.float32)                       # [B, tD]
    w_inv_std_g = w_ref[...] * lax.rsqrt(var_g + EPS)                         # [B, tD]
    w_inv_std_n = jnp.dot(seg_t, w_inv_std_g,
                          preferred_element_type=jnp.float32)                 # [Np, tD]

    o_ref[...] = demean * w_inv_std_n + b_ref[...]


def _pick_d_tile(n_pad, d_pad, budget_bytes=VMEM_BUDGET):
    """Largest multiple-of-128 divisor of d_pad whose double-buffered feats and
    output tiles (2 arrays x 2 buffers x n_pad x t x 4B) fit the VMEM budget."""
    t = d_pad
    while t > LANE:
        if d_pad % t == 0 and (16 * n_pad * t) <= budget_bytes:
            return t
        t -= LANE
    return LANE


def graph_norm(feats, batch_num_nodes, weight, bias, mean_scale, *, d_tile=None):
    """feats: [N, D] f32; batch_num_nodes: [B] int32; params: [D] f32."""
    N, D = feats.shape
    B = batch_num_nodes.shape[0]

    # ---- pad: D to a lane-dense multiple of 128, N to a sublane multiple of 8 ----
    Dp = pl.cdiv(D, LANE) * LANE
    Np = pl.cdiv(N, SUBLANE) * SUBLANE
    pad_d = Dp - D
    pad_n = Np - N

    x = feats.astype(jnp.float32)
    if pad_d or pad_n:
        x = jnp.pad(x, ((0, pad_n), (0, pad_d)))

    def pad_param(p):
        p = p.reshape(1, D).astype(jnp.float32)
        return jnp.pad(p, ((0, 0), (0, pad_d))) if pad_d else p

    w2, b2, ms2 = pad_param(weight), pad_param(bias), pad_param(mean_scale)

    # ---- plain-JAX glue: segment matrices (counts folded in, empty-graph safe,
    #      padded rows/cols belong to no graph) ----
    gid = jnp.repeat(jnp.arange(B, dtype=jnp.int32), batch_num_nodes,
                     total_repeat_length=N)                                   # [N]
    onehot = (gid[None, :] == jnp.arange(B, dtype=jnp.int32)[:, None]
              ).astype(jnp.float32)                                           # [B, N]
    if pad_n:
        onehot = jnp.pad(onehot, ((0, 0), (0, pad_n)))                        # [B, Np]
    counts = batch_num_nodes.astype(jnp.float32)
    inv_n = jnp.where(counts > 0, 1.0 / jnp.maximum(counts, 1.0), 0.0)        # guard n=0
    seg_m = onehot * inv_n[:, None]                                           # [B, Np]
    seg_t = onehot.T                                                          # [Np, B]

    if d_tile is None:
        d_tile = _pick_d_tile(Np, Dp)
    assert Dp % d_tile == 0 and d_tile % LANE == 0
    grid = (Dp // d_tile,)

    cost = pl.CostEstimate(
        flops=6 * B * Np * Dp + 4 * Np * Dp + 4 * B * Dp,
        transcendentals=B * Dp,
        bytes_accessed=4 * (2 * B * Np + 2 * Np * Dp + 3 * Dp),
    )

    out = pl.pallas_call(
        graphnorm_kernel,
        out_shape=jax.ShapeDtypeStruct((Np, Dp), jnp.float32),
        grid=grid,
        in_specs=[
            pl.BlockSpec((B, Np), lambda d: (0, 0)),        # seg_m (reused each D-tile)
            pl.BlockSpec((Np, B), lambda d: (0, 0)),        # seg_t (reused each D-tile)
            pl.BlockSpec((Np, d_tile), lambda d: (0, d)),   # feats tile
            pl.BlockSpec((1, d_tile), lambda d: (0, d)),    # weight
            pl.BlockSpec((1, d_tile), lambda d: (0, d)),    # bias
            pl.BlockSpec((1, d_tile), lambda d: (0, d)),    # mean_scale
        ],
        out_specs=pl.BlockSpec((Np, d_tile), lambda d: (0, d)),
        compiler_params=pltpu.CompilerParams(
            dimension_semantics=("parallel",),              # D-tiles are independent
            vmem_limit_bytes=32 * 1024 * 1024,              # safe on v5e/v6e/v7x
        ),
        cost_estimate=cost,
    )(seg_m, seg_t, x, w2, b2, ms2)

    if pad_d or pad_n:
        out = out[:N, :D]
    return out


def graph_norm_ref(feats, batch_num_nodes, weight, bias, mean_scale):
    """Pure-JAX reference mirroring the PyTorch/DGL forward."""
    N, D = feats.shape
    B = batch_num_nodes.shape[0]
    gid = jnp.repeat(jnp.arange(B), batch_num_nodes, total_repeat_length=N)
    counts = batch_num_nodes.astype(jnp.float32)[:, None]
    mean = jax.ops.segment_sum(feats, gid, num_segments=B) / counts
    mean_n = mean[gid]
    demean = feats - mean_n * mean_scale[None, :]
    var = jax.ops.segment_sum(demean * demean, gid, num_segments=B) / counts
    std_n = jnp.sqrt(var + EPS)[gid]
    return weight[None, :] * demean / std_n + bias[None, :]


if __name__ == "__main__":
    root = jax.random.PRNGKey(0)

    def run_case(batch_num_nodes, D, key):
        N = int(batch_num_nodes.sum())
        kf, kw, kb, km = jax.random.split(key, 4)
        feats = jax.random.normal(kf, (N, D), dtype=jnp.float32)
        weight = 1.0 + 0.1 * jax.random.normal(kw, (D,), dtype=jnp.float32)
        bias = 0.1 * jax.random.normal(kb, (D,), dtype=jnp.float32)
        mean_scale = 1.0 + 0.1 * jax.random.normal(km, (D,), dtype=jnp.float32)

        out = graph_norm(feats, batch_num_nodes, weight, bias, mean_scale)
        out = jax.block_until_ready(out)
        ref = graph_norm_ref(feats, batch_num_nodes, weight, bias, mean_scale)
        assert out.shape == (N, D)
        assert jnp.allclose(out, ref, atol=1e-4, rtol=1e-4), \
            float(jnp.max(jnp.abs(out - ref)))

    k1, k2, k3 = jax.random.split(root, 3)
    # Case 1: 3 graphs, D=32 (pads to 128 lanes, single D-tile), N=16 (sublane aligned)
    run_case(jnp.array([5, 7, 4], dtype=jnp.int32), 32, k1)
    # Case 2: includes an empty graph; N=24 needs no pad, D=200 pads to 256 (one wide tile)
    run_case(jnp.array([6, 0, 10, 8], dtype=jnp.int32), 200, k2)
    # Case 3: N=10 pads to 16 rows; D=256 exercises the adaptive single-step tile
    run_case(jnp.array([3, 5, 2], dtype=jnp.int32), 256, k3)

    print("KERNEL_OK")
</pallas_src>

<mosaic_0001>
module attributes {stable_mosaic.version = 11 : i64} {
  func.func @graphnorm_kernel(%arg0: i32, %arg1: memref<3x16xf32, #tpu.memory_space<vmem>>, %arg2: memref<16x3xf32, #tpu.memory_space<vmem>>, %arg3: memref<16x128xf32, #tpu.memory_space<vmem>>, %arg4: memref<1x128xf32, #tpu.memory_space<vmem>>, %arg5: memref<1x128xf32, #tpu.memory_space<vmem>>, %arg6: memref<1x128xf32, #tpu.memory_space<vmem>>, %arg7: memref<16x128xf32, #tpu.memory_space<vmem>>) attributes {dimension_semantics = [#tpu.dimension_semantics<parallel>], iteration_bounds = array<i64: 1>, scalar_prefetch = 0 : i64, scratch_operands = 0 : i64, tpu.core_type = #tpu.core_type<tc>, window_params = [{pipeline_mode = #tpu.pipeline_mode<synchronous>, transform_indices = @transform_0, window_bounds = array<i64: 3, 16>}, {pipeline_mode = #tpu.pipeline_mode<synchronous>, transform_indices = @transform_1, window_bounds = array<i64: 16, 3>}, {transform_indices = @transform_2, window_bounds = array<i64: 16, 128>}, {transform_indices = @transform_3, window_bounds = array<i64: 1, 128>}, {transform_indices = @transform_4, window_bounds = array<i64: 1, 128>}, {transform_indices = @transform_5, window_bounds = array<i64: 1, 128>}, {transform_indices = @transform_6, window_bounds = array<i64: 16, 128>}]} {
    %c0 = arith.constant 0 : index
    %c0_0 = arith.constant 0 : index
    %0 = vector.load %arg1[%c0, %c0_0] : memref<3x16xf32, #tpu.memory_space<vmem>>, vector<3x16xf32>
    %c0_1 = arith.constant 0 : index
    %c0_2 = arith.constant 0 : index
    %1 = vector.load %arg2[%c0_1, %c0_2] : memref<16x3xf32, #tpu.memory_space<vmem>>, vector<16x3xf32>
    %c0_3 = arith.constant 0 : index
    %c0_4 = arith.constant 0 : index
    %2 = vector.load %arg3[%c0_3, %c0_4] : memref<16x128xf32, #tpu.memory_space<vmem>>, vector<16x128xf32>
    %cst = arith.constant dense<0.000000e+00> : vector<3x128xf32>
    %3 = tpu.matmul %0, %2, %cst {dimension_numbers = #tpu.dot_dimension_numbers<[1], [0], [0], [1], [0, 0, 1, 1], [], []>} : vector<3x16xf32>, vector<16x128xf32>, vector<3x128xf32> -> vector<3x128xf32>
    %c0_5 = arith.constant 0 : index
    %c0_6 = arith.constant 0 : index
    %4 = vector.load %arg6[%c0_5, %c0_6] : memref<1x128xf32, #tpu.memory_space<vmem>>, vector<1x128xf32>
    %5 = vector.broadcast %4 : vector<1x128xf32> to vector<3x128xf32>
    %6 = arith.mulf %3, %5 : vector<3x128xf32>
    %cst_7 = arith.constant dense<0.000000e+00> : vector<16x128xf32>
    %7 = tpu.matmul %1, %6, %cst_7 {dimension_numbers = #tpu.dot_dimension_numbers<[1], [0], [0], [1], [0, 0, 1, 1], [], []>} : vector<16x3xf32>, vector<3x128xf32>, vector<16x128xf32> -> vector<16x128xf32>
    %8 = arith.subf %2, %7 : vector<16x128xf32>
    %9 = arith.mulf %8, %8 : vector<16x128xf32>
    %cst_8 = arith.constant dense<0.000000e+00> : vector<3x128xf32>
    %10 = tpu.matmul %0, %9, %cst_8 {dimension_numbers = #tpu.dot_dimension_numbers<[1], [0], [0], [1], [0, 0, 1, 1], [], []>} : vector<3x16xf32>, vector<16x128xf32>, vector<3x128xf32> -> vector<3x128xf32>
    %c0_9 = arith.constant 0 : index
    %c0_10 = arith.constant 0 : index
    %11 = vector.load %arg4[%c0_9, %c0_10] : memref<1x128xf32, #tpu.memory_space<vmem>>, vector<1x128xf32>
    %cst_11 = arith.constant 9.99999974E-6 : f32
    %12 = vector.broadcast %cst_11 : f32 to vector<3x128xf32>
    %13 = arith.addf %10, %12 : vector<3x128xf32>
    %14 = math.rsqrt %13 : vector<3x128xf32>
    %15 = vector.broadcast %11 : vector<1x128xf32> to vector<3x128xf32>
    %16 = arith.mulf %15, %14 : vector<3x128xf32>
    %cst_12 = arith.constant dense<0.000000e+00> : vector<16x128xf32>
    %17 = tpu.matmul %1, %16, %cst_12 {dimension_numbers = #tpu.dot_dimension_numbers<[1], [0], [0], [1], [0, 0, 1, 1], [], []>} : vector<16x3xf32>, vector<3x128xf32>, vector<16x128xf32> -> vector<16x128xf32>
    %18 = arith.mulf %8, %17 : vector<16x128xf32>
    %c0_13 = arith.constant 0 : index
    %c0_14 = arith.constant 0 : index
    %19 = vector.load %arg5[%c0_13, %c0_14] : memref<1x128xf32, #tpu.memory_space<vmem>>, vector<1x128xf32>
    %20 = vector.broadcast %19 : vector<1x128xf32> to vector<16x128xf32>
    %21 = arith.addf %18, %20 : vector<16x128xf32>
    %c0_15 = arith.constant 0 : index
    %c0_16 = arith.constant 0 : index
    %22 = vector.load %arg7[%c0_15, %c0_16] : memref<16x128xf32, #tpu.memory_space<vmem>>, vector<16x128xf32>
    tpu.vector_store %arg7[%c0_15, %c0_16], %21 {strides = array<i32>} : memref<16x128xf32, #tpu.memory_space<vmem>>, vector<16x128xf32>,
    return
  }
  func.func @transform_0(%arg0: i32) -> (i32, i32) {
    %c0_i32 = arith.constant 0 : i32
    %c0_i32_0 = arith.constant 0 : i32
    %c0_i32_1 = arith.constant 0 : i32
    return %c0_i32, %c0_i32_0 : i32, i32
  }
  func.func @transform_1(%arg0: i32) -> (i32, i32) {
    %c0_i32 = arith.constant 0 : i32
    %c0_i32_0 = arith.constant 0 : i32
    %c0_i32_1 = arith.constant 0 : i32
    return %c0_i32, %c0_i32_0 : i32, i32
  }
  func.func @transform_2(%arg0: i32) -> (i32, i32) {
    %c0_i32 = arith.constant 0 : i32
    %c0_i32_0 = arith.constant 0 : i32
    return %c0_i32, %arg0 : i32, i32
  }
  func.func @transform_3(%arg0: i32) -> (i32, i32) {
    %c0_i32 = arith.constant 0 : i32
    %c0_i32_0 = arith.constant 0 : i32
    return %c0_i32, %arg0 : i32, i32
  }
  func.func @transform_4(%arg0: i32) -> (i32, i32) {
    %c0_i32 = arith.constant 0 : i32
    %c0_i32_0 = arith.constant 0 : i32
    return %c0_i32, %arg0 : i32, i32
  }
  func.func @transform_5(%arg0: i32) -> (i32, i32) {
    %c0_i32 = arith.constant 0 : i32
    %c0_i32_0 = arith.constant 0 : i32
    return %c0_i32, %arg0 : i32, i32
  }
  func.func @transform_6(%arg0: i32) -> (i32, i32) {
    %c0_i32 = arith.constant 0 : i32
    %c0_i32_0 = arith.constant 0 : i32
    return %c0_i32, %arg0 : i32, i32
  }
}

</mosaic_0001>

<bundles_post_ra>
// kernel: tpu_custom_call.1
= control target key start
LH: loop header
LB: loop body
LE: loop exit
PB: predicated region body
PF: predicated region fallthrough
CT: control target
= control target key end

     0   :  { %v463_v1 = vmov 0.0   ;;  %vm464_vm0 = vmmov 0   ;;  %s542_s0 = inlined_call_operand.vmem [shape: f32[3,16], index: 0, kind: input, shape index: {}]   ;;  %s543_s1 = inlined_call_operand.vmem [shape: f32[16,3], index: 1, kind: input, shape index: {}]   ;;  %s544_s2 = inlined_call_operand.vmem [shape: f32[16,128], index: 2, kind: input, shape index: {}]   ;;  %s545_s3 = inlined_call_operand.vmem [shape: f32[1,128], index: 3, kind: input, shape index: {}]   ;;  %s546_s4 = inlined_call_operand.vmem [shape: f32[1,128], index: 4, kind: input, shape index: {}]   ;;  %s547_s5 = inlined_call_operand.vmem [shape: f32[1,128], index: 5, kind: input, shape index: {}]   ;;  %s548_s6 = inlined_call_operand.hbm [shape: f32[16,128], index: 6, kind: output, shape index: {}]  }
   0x1   :  { %v28_v0 = vld [vmem:[%s544_s2 + $0x8] sm:$0xff]  ;;  %410 = vmatprep.subr.mxu0 %v463_v1  ;;  %v27_v2 = vld [vmem:[%s544_s2] sm:$0xff]  ;;  %414 = vmatprep.mubr.msk.f32.mxu0 %vm464_vm0, %v463_v1 }
   0x2   :  { %11 = vsyncpa [#allocation3], 0  ;;  %411 = vmatpush3.msra.mxu0 %v28_v0  ;;  %v24_v3 = vld [vmem:[%s542_s0] sm:$0x7]  ;;  %vm29_vm1 = vcmask 130048   ;;  %vm111_vm2 = vcmask 23552  }
   0x3   :  { %412 = vmatprep.subr.mxu0 %v463_v1  ;;  %v25_v4 = vld [vmem:[%s543_s1] sm:$0xff]  ;;  %vm118_vm3 = vcmask 1042432   ;;  %v26_v9 = vld [vmem:[%s543_s1 + $0x8] sm:$0xff]  ;;  %s465_s9 = smov [#allocation2]  }
   0x4   :  { %413 = vmatpush3.msra.mxu0 %v27_v2  ;;  %419 = vmatprep.mubr.msk.f32.mxu1 %vm111_vm2, %v25_v4  ;;  %v388_v5 = vld [vmem:[%s547_s5] ss:$0 sm:$0xff]  ;;  %s376_s10 = sshll.u32 %s465_s9, 4  ;;  %s377_s10 = int_to_ptr.vmem [resolvable:$true] %s376_s10 }
   0x5   :  { %415 = vmatmul.mubr.msk.f32.vlgmr.msra.gmra.mxu0 %vm29_vm1, %v24_v3  ;;  %v393_v19 = vld [vmem:[%s545_s3] ss:$0 sm:$0xff]  ;;  %s441_s3 = scalar_lea.vmem %s377_s10, 256  ;;  %p446_p1 = scmp.lt.s32.totalorder %s377_s10, %s377_s10 }
   0x6   :  { %431 = vmatprep.mubr.msk.f32.mxu0 %vm111_vm2, %v25_v4  ;;  %v397_v23 = vld [vmem:[%s546_s4] ss:$0 sm:$0xff]  ;;  %p442_p0 = scmp.ne.s32.totalorder %s377_s10, %s441_s3  ;;  %p447_p2 = scmp.lt.s32.totalorder %s441_s3, %s441_s3 }
   0x8   :  { %p448_p3 = por %p447_p2, %p446_p1 }
   0xa   :  { %p449_p4 = pnand %p448_p3, %p442_p0 }
  0xc5   :  { %v99_v6 = vpop.f32.mrf.mxu0 }
  0xc6   :  { %v110_v7 = vmul.f32 %v388_v5, %v99_v6 }
  0xc7   :  { %v416_v8 = vpop.f32.mrf.mxu0 }
  0xc8   :  { %417 = vmatprep.subr.msk.mxu1 %vm118_vm3, %v110_v7 }
  0xc9   :  { %418 = vmatpush3.msk.msra.mxu1 %vm118_vm3, %v110_v7 }
  0xca   :  { %420 = vmatmul.mubr.msk.f32.vlgmr.msra.gmra.mxu1 %vm111_vm2, %v26_v9  ;;  %422 = vmatprep.subr.mxu1 %v463_v1 }
  0xcb   :  { %426 = vmatprep.mubr.msk.f32.mxu1 %vm464_vm0, %v463_v1 }
 0x18a   :  { %v421_v10 = vpop.f32.mrf.mxu1 }
 0x18b   :  { %v198_v11 = vsub.f32 %v28_v0, %v421_v10 }
 0x18c   :  { %v188_v12 = vpop.f32.mrf.mxu1 }
 0x18d   :  { %v200_v13 = vmul.f32 %v198_v11, %v198_v11  ;;  %v197_v14 = vsub.f32 %v27_v2, %v188_v12 }
 0x18f   :  { %v199_v15 = vmul.f32 %v197_v14, %v197_v14  ;;  %423 = vmatpush3.msra.mxu1 %v200_v13 }
 0x190   :  { %424 = vmatprep.subr.mxu1 %v463_v1 }
 0x191   :  { %425 = vmatpush3.msra.mxu1 %v199_v15 }
 0x192   :  { %427 = vmatmul.mubr.msk.f32.vlgmr.msra.gmra.mxu1 %vm29_vm1, %v24_v3 }
 0x252   :  { %v268_v16 = vpop.f32.mrf.mxu1 }
 0x253   :  { %v269_v17 = vadd.f32 1e-05, %v268_v16 }
 0x254   :  { %v428_v18 = vpop.f32.mrf.mxu1 }
 0x255   :  { %439 = vrsqrt.f32 %v269_v17 }
 0x262   :  { %v440_v20 = vpop.eup %439 }
 0x263   :  { %v279_v21 = vmul.f32 %v440_v20, %v393_v19 }
 0x265   :  { %429 = vmatprep.subr.msk.mxu0 %vm118_vm3, %v279_v21 }
 0x266   :  { %430 = vmatpush3.msk.msra.mxu0 %vm118_vm3, %v279_v21 }
 0x267   :  { %432 = vmatmul.mubr.msk.f32.vlgmr.msra.gmra.mxu0 %vm111_vm2, %v26_v9 }
 0x327   :  { %v433_v22 = vpop.f32.mrf.mxu0 }
 0x328   :  { %v359_v24 = vmul.f32 %v433_v22, %v198_v11 }
 0x329   :  { %v349_v25 = vpop.f32.mrf.mxu0 }
 0x32a   :  { %v368_v26 = vadd.f32 %v397_v23, %v359_v24  ;;  %v358_v27 = vmul.f32 %v349_v25, %v197_v14 }
 0x32c   :  { %370 = vst [vmem:[#allocation2 + $0x8] sm:$0xff] %v368_v26  ;;  %v367_v28 = vadd.f32 %v397_v23, %v358_v27 }
 0x32e   :  { %369 = vst [vmem:[#allocation2] sm:$0xff] %v367_v28 }
 0x32f   :  { %452 = shalt.err (!%p449_p4)
}
 0x330   :  { %s466_s11 = smov 128   ;;  %s467_s12 = smov 8  }
 0x331   :  { %382 = dma.vmem_to_hbm [thread:$0]  %s377_s10, 256, %s548_s6, [#allocation3], %s466_s11, %s466_s11, %s467_s12  }
 0x332   :  { %461 = dma.done.wait [#allocation3], 256  }
 0x333   :  { %462 = vsyncadd [#allocation3], 4294967040 }
 0x334   :  { %386 = vsyncpa [#allocation3], 1 }

</bundles_post_ra>
